<compile_context>
chip_gen: v7x
topology: tpu7x:2x2x1
jax: 0.10.0
libtpu: 0.0.40
codegen_flags: <defaults>
</compile_context>

<pallas_src>
import functools

import jax
import jax.numpy as jnp
from jax import lax
from jax.experimental import pallas as pl
from jax.experimental.pallas import tpu as pltpu


_LANE = 128
_VMEM_LIMIT = 64 * 1024 * 1024  # explicit scoped-VMEM budget (<= physical on all chips)


def _round_up(n, m):
    return ((n + m - 1) // m) * m


def _sublane_rows(dtype):
    # Rows per vreg sublane tile: f32 -> 8, bf16 -> 16, int8/fp8 -> 32.
    return 8 * (4 // jnp.dtype(dtype).itemsize)


# --------------------------------------------------------------------------
# Pass 1: fused QKV projection.  qkv = x_tile @ [Wq*scale | Wk | Wv]^T
# --------------------------------------------------------------------------
def _qkv_proj_kernel(x_ref, w_ref, q_ref, k_ref, v_ref, *, d_out_p):
    # One MXU matmul produces Q (pre-scaled), K and V for this sequence tile.
    qkv = jnp.dot(x_ref[...], w_ref[...], preferred_element_type=jnp.float32)
    q_ref[...] = qkv[:, :d_out_p].astype(q_ref.dtype)            # lane-aligned
    k_ref[...] = qkv[:, d_out_p:2 * d_out_p].astype(k_ref.dtype)  # slices
    v_ref[...] = qkv[:, 2 * d_out_p:].astype(v_ref.dtype)


# --------------------------------------------------------------------------
# Pass 2: flash attention with online softmax over (q_tiles, kv_tiles).
# --------------------------------------------------------------------------
def _flash_attn_kernel(q_ref, k_ref, v_ref, o_ref, m_sc, l_sc, acc_sc,
                       *, seq_len, kv_tile):
    ki = pl.program_id(1)
    nk = pl.num_programs(1)
    dtype = q_ref.dtype

    @pl.when(ki == 0)
    def _init():
        m_sc[...] = jnp.full_like(m_sc, -jnp.inf)
        l_sc[...] = jnp.zeros_like(l_sc)
        acc_sc[...] = jnp.zeros_like(acc_sc)

    # scores = (q * 1/sqrt(d_out)) @ k.T  -- the scale is already folded into
    # the Q weight; contraction on the shared last dim (no materialized
    # transpose, standard flash q@k.T MXU pattern).
    contract_last = (((1,), (1,)), ((), ()))
    s = lax.dot_general(q_ref[...], k_ref[...], contract_last,
                        preferred_element_type=jnp.float32)  # [q_tile, kv_tile]

    if seq_len % kv_tile != 0:
        # Mask zero-padded kv columns.  The wrapper guarantees
        # T_pad - T < kv_tile, i.e. every kv tile keeps at least one valid
        # column, so m/alpha never degenerate to NaN.
        col = ki * kv_tile + lax.broadcasted_iota(jnp.int32, s.shape, 1)
        s = jnp.where(col < seq_len, s, -1e30)

    # Online (streaming) softmax update.  The only per-step cast is p->dtype.
    m_prev = m_sc[...]
    m_new = jnp.maximum(m_prev, jnp.max(s, axis=-1, keepdims=True))
    alpha = jnp.exp(m_prev - m_new)
    p = jnp.exp(s - m_new)
    l_sc[...] = alpha * l_sc[...] + jnp.sum(p, axis=-1, keepdims=True)
    acc_sc[...] = alpha * acc_sc[...] + jnp.dot(
        p.astype(dtype), v_ref[...], preferred_element_type=jnp.float32)
    m_sc[...] = m_new

    @pl.when(ki == nk - 1)
    def _finalize():
        l = l_sc[...]
        r = pl.reciprocal(l, approx=True)   # EUP estimate (otherwise-idle slot)
        inv = r * (2.0 - l * r)             # one Newton step -> f32 accuracy
        o_ref[...] = (acc_sc[...] * inv).astype(o_ref.dtype)


# --------------------------------------------------------------------------
# Wrapper
# --------------------------------------------------------------------------
def self_attention_v2(x, w_query, w_key, w_value, *, compute_dtype=None):
    """x: [T, d_in]; w_*: [d_out, d_in] (PyTorch nn.Linear weight layout)."""
    T, d_in = x.shape
    d_out = w_query.shape[0]
    dtype = jnp.dtype(compute_dtype) if compute_dtype is not None else x.dtype

    d_out_p = _round_up(d_out, _LANE)
    pad_o = d_out_p - d_out

    # One-time weight prep (fuses under jit): fold 1/sqrt(d_out) into Wq,
    # zero-pad d_out to 128 lanes, pre-transpose to [d_in, .] so the
    # projection contracts row-major (no XLU relayout), concat Q|K|V so the
    # projection is a single MXU matmul per sequence tile.
    scale = 1.0 / (float(d_out) ** 0.5)

    def _prep(w, s=1.0):
        return jnp.pad((w * s).astype(dtype), ((0, pad_o), (0, 0))).T

    w_all = jnp.concatenate(
        [_prep(w_query, scale), _prep(w_key), _prep(w_value)], axis=1)  # [d_in, 3*d_out_p]

    # Sequence tiling: decoupled q / kv tiles sized for v6e/v7x's 256-wide
    # MXU, rounded to the dtype sublane packing.  q_tile divides kv_tile and
    # kv_tile divides T_pad => T_pad - T < kv_tile => no fully-masked kv tile.
    sub = _sublane_rows(dtype)
    if T <= 256:
        q_tile = kv_tile = _round_up(T, sub)
    else:
        q_tile = 256
        kv_tile = 512 if T >= 512 else 256
    T_pad = _round_up(T, kv_tile)
    assert kv_tile % q_tile == 0 and T_pad % kv_tile == 0
    assert T_pad - T < kv_tile  # guards the online-softmax NaN hazard

    x_c = x.astype(dtype)
    x_p = jnp.pad(x_c, ((0, T_pad - T), (0, 0))) if T_pad != T else x_c

    # -------- pass 1: QKV projection (K/V computed once per token) ---------
    proj_tile = kv_tile
    qkv_shape = jax.ShapeDtypeStruct((T_pad, d_out_p), dtype)
    q, k, v = pl.pallas_call(
        functools.partial(_qkv_proj_kernel, d_out_p=d_out_p),
        out_shape=(qkv_shape, qkv_shape, qkv_shape),
        grid_spec=pltpu.PrefetchScalarGridSpec(
            num_scalar_prefetch=0,
            grid=(T_pad // proj_tile,),
            in_specs=[
                pl.BlockSpec((proj_tile, d_in), lambda i: (i, 0)),
                # TODO(synk): for very large d_in*d_out (v7x 64 MiB VMEM),
                # tile this constant weight block along d_in and/or
                # single-buffer it (pipeline_mode=pl.Buffered(1)).
                pl.BlockSpec((d_in, 3 * d_out_p), lambda i: (0, 0)),
            ],
            out_specs=(
                pl.BlockSpec((proj_tile, d_out_p), lambda i: (i, 0)),
                pl.BlockSpec((proj_tile, d_out_p), lambda i: (i, 0)),
                pl.BlockSpec((proj_tile, d_out_p), lambda i: (i, 0)),
            )),
        compiler_params=pltpu.CompilerParams(
            dimension_semantics=("parallel",),
            vmem_limit_bytes=_VMEM_LIMIT),
    )(x_p, w_all)

    # -------- pass 2: flash attention -------------------------------------
    # Note (v7x): for short sequences nq may be 1, leaving one TensorCore
    # idle; long sequences (the regime that matters) shard across both cores
    # via the "parallel" q axis.
    nq = T_pad // q_tile
    nk = T_pad // kv_tile
    out = pl.pallas_call(
        functools.partial(_flash_attn_kernel, seq_len=T, kv_tile=kv_tile),
        out_shape=jax.ShapeDtypeStruct((T_pad, d_out_p), dtype),
        grid_spec=pltpu.PrefetchScalarGridSpec(
            num_scalar_prefetch=0,
            grid=(nq, nk),
            in_specs=[
                pl.BlockSpec((q_tile, d_out_p), lambda qi, ki: (qi, 0)),
                pl.BlockSpec((kv_tile, d_out_p), lambda qi, ki: (ki, 0)),
                pl.BlockSpec((kv_tile, d_out_p), lambda qi, ki: (ki, 0)),
            ],
            out_specs=pl.BlockSpec((q_tile, d_out_p), lambda qi, ki: (qi, 0)),
            scratch_shapes=[
                pltpu.VMEM((q_tile, 1), jnp.float32),        # running max m
                pltpu.VMEM((q_tile, 1), jnp.float32),        # running sum l
                pltpu.VMEM((q_tile, d_out_p), jnp.float32),  # output accumulator
            ]),
        compiler_params=pltpu.CompilerParams(
            dimension_semantics=("parallel", "arbitrary"),
            vmem_limit_bytes=_VMEM_LIMIT),
    )(q, k, v)

    # Strip sequence/lane padding back to the module's output shape.  (If a
    # downstream kernel can consume the lane-dense padded slab, return `out`
    # directly to avoid the extra copy / write traffic.)
    return out[:T, :d_out]


def _reference(x, w_query, w_key, w_value):
    # Pure-JAX reference mirroring the PyTorch forward.
    q = x @ w_query.T
    k = x @ w_key.T
    v = x @ w_value.T
    scores = q @ k.T
    w = jax.nn.softmax(scores / (k.shape[-1] ** 0.5), axis=-1)
    return w @ v


if __name__ == "__main__":
    # Small shapes consistent with the module: seq=8 tokens, d_in=16, d_out=32.
    T, d_in, d_out = 8, 16, 32

    key = jax.random.PRNGKey(0)
    kx, kq, kk, kv_key = jax.random.split(key, 4)

    x = jax.random.normal(kx, (T, d_in), dtype=jnp.float32)
    # PyTorch nn.Linear weight layout: (d_out, d_in).
    w_query = jax.random.normal(kq, (d_out, d_in), dtype=jnp.float32) * 0.1
    w_key = jax.random.normal(kk, (d_out, d_in), dtype=jnp.float32) * 0.1
    w_value = jax.random.normal(kv_key, (d_out, d_in), dtype=jnp.float32) * 0.1

    ref = _reference(x, w_query, w_key, w_value)

    # f32 compute path (matches the PyTorch module semantics).
    fn = jax.jit(self_attention_v2)
    out = jax.block_until_ready(fn(x, w_query, w_key, w_value))
    assert out.shape == (T, d_out)
    assert jnp.allclose(out, ref, atol=1e-4, rtol=1e-4), "f32 mismatch vs reference"

    # bf16 compute path (per perf feedback: bf16 MXU operands, f32 accumulation).
    fn_bf16 = jax.jit(functools.partial(self_attention_v2, compute_dtype=jnp.bfloat16))
    out_bf16 = jax.block_until_ready(fn_bf16(x, w_query, w_key, w_value))
    assert out_bf16.shape == (T, d_out)
    assert jnp.allclose(out_bf16.astype(jnp.float32), ref, atol=5e-2, rtol=5e-2), \
        "bf16 mismatch vs reference"

    print("KERNEL_OK")
</pallas_src>

<mosaic_0001>
module attributes {stable_mosaic.version = 11 : i64} {
  func.func @_flash_attn_kernel(%arg0: i32, %arg1: i32, %arg2: memref<8x128xf32, #tpu.memory_space<vmem>>, %arg3: memref<8x128xf32, #tpu.memory_space<vmem>>, %arg4: memref<8x128xf32, #tpu.memory_space<vmem>>, %arg5: memref<8x128xf32, #tpu.memory_space<vmem>>, %arg6: memref<8x1xf32, #tpu.memory_space<vmem>>, %arg7: memref<8x1xf32, #tpu.memory_space<vmem>>, %arg8: memref<8x128xf32, #tpu.memory_space<vmem>>) attributes {dimension_semantics = [#tpu.dimension_semantics<parallel>, #tpu.dimension_semantics<arbitrary>], iteration_bounds = array<i64: 1, 1>, scalar_prefetch = 0 : i64, scratch_operands = 3 : i64, tpu.core_type = #tpu.core_type<tc>, window_params = [{transform_indices = @transform_0, window_bounds = array<i64: 8, 128>}, {transform_indices = @transform_1, window_bounds = array<i64: 8, 128>}, {transform_indices = @transform_2, window_bounds = array<i64: 8, 128>}, {transform_indices = @transform_3, window_bounds = array<i64: 8, 128>}]} {
    %c0_i32 = arith.constant 0 : i32
    %0 = arith.cmpi eq, %arg1, %c0_i32 : i32
    %1 = arith.extui %0 : i1 to i32
    %c0_i32_0 = arith.constant 0 : i32
    %2 = arith.cmpi ne, %1, %c0_i32_0 : i32
    scf.if %2 {
      %cst_23 = arith.constant 0xFF800000 : f32
      %32 = vector.broadcast %cst_23 : f32 to vector<8x1xf32>
      %c0_24 = arith.constant 0 : index
      %c0_25 = arith.constant 0 : index
      %33 = vector.load %arg6[%c0_24, %c0_25] : memref<8x1xf32, #tpu.memory_space<vmem>>, vector<8x1xf32>
      tpu.vector_store %arg6[%c0_24, %c0_25], %32 {strides = array<i32>} : memref<8x1xf32, #tpu.memory_space<vmem>>, vector<8x1xf32>,
      %cst_26 = arith.constant 0.000000e+00 : f32
      %34 = vector.broadcast %cst_26 : f32 to vector<8x1xf32>
      %c0_27 = arith.constant 0 : index
      %c0_28 = arith.constant 0 : index
      %35 = vector.load %arg7[%c0_27, %c0_28] : memref<8x1xf32, #tpu.memory_space<vmem>>, vector<8x1xf32>
      tpu.vector_store %arg7[%c0_27, %c0_28], %34 {strides = array<i32>} : memref<8x1xf32, #tpu.memory_space<vmem>>, vector<8x1xf32>,
      %cst_29 = arith.constant 0.000000e+00 : f32
      %36 = vector.broadcast %cst_29 : f32 to vector<8x128xf32>
      %c0_30 = arith.constant 0 : index
      %c0_31 = arith.constant 0 : index
      %37 = vector.load %arg8[%c0_30, %c0_31] : memref<8x128xf32, #tpu.memory_space<vmem>>, vector<8x128xf32>
      tpu.vector_store %arg8[%c0_30, %c0_31], %36 {strides = array<i32>} : memref<8x128xf32, #tpu.memory_space<vmem>>, vector<8x128xf32>,
    } else {
    }
    %c0 = arith.constant 0 : index
    %c0_1 = arith.constant 0 : index
    %3 = vector.load %arg2[%c0, %c0_1] : memref<8x128xf32, #tpu.memory_space<vmem>>, vector<8x128xf32>
    %c0_2 = arith.constant 0 : index
    %c0_3 = arith.constant 0 : index
    %4 = vector.load %arg3[%c0_2, %c0_3] : memref<8x128xf32, #tpu.memory_space<vmem>>, vector<8x128xf32>
    %cst = arith.constant dense<0.000000e+00> : vector<8x8xf32>
    %5 = tpu.matmul %3, %4, %cst {dimension_numbers = #tpu.dot_dimension_numbers<[1], [1], [0], [0], [0, 0, 1, 0], [], []>} : vector<8x128xf32>, vector<8x128xf32>, vector<8x8xf32> -> vector<8x8xf32>
    %c0_4 = arith.constant 0 : index
    %c0_5 = arith.constant 0 : index
    %6 = vector.load %arg6[%c0_4, %c0_5] : memref<8x1xf32, #tpu.memory_space<vmem>>, vector<8x1xf32>
    %cst_6 = arith.constant dense<0xFF800000> : vector<8xf32>
    %7 = vector.multi_reduction <maximumf>, %5, %cst_6 [1] : vector<8x8xf32> to vector<8xf32>
    %8 = vector.shape_cast %7 : vector<8xf32> to vector<8x1xf32>
    %9 = arith.maximumf %6, %8 : vector<8x1xf32>
    %10 = arith.subf %6, %9 : vector<8x1xf32>
    %11 = math.exp %10 : vector<8x1xf32>
    %12 = vector.broadcast %9 : vector<8x1xf32> to vector<8x8xf32>
    %13 = arith.subf %5, %12 : vector<8x8xf32>
    %14 = math.exp %13 : vector<8x8xf32>
    %c0_7 = arith.constant 0 : index
    %c0_8 = arith.constant 0 : index
    %15 = vector.load %arg7[%c0_7, %c0_8] : memref<8x1xf32, #tpu.memory_space<vmem>>, vector<8x1xf32>
    %16 = arith.mulf %11, %15 : vector<8x1xf32>
    %cst_9 = arith.constant dense<0.000000e+00> : vector<8xf32>
    %17 = vector.multi_reduction <add>, %14, %cst_9 [1] : vector<8x8xf32> to vector<8xf32>
    %18 = vector.shape_cast %17 : vector<8xf32> to vector<8x1xf32>
    %19 = arith.addf %16, %18 : vector<8x1xf32>
    %c0_10 = arith.constant 0 : index
    %c0_11 = arith.constant 0 : index
    %20 = vector.load %arg7[%c0_10, %c0_11] : memref<8x1xf32, #tpu.memory_space<vmem>>, vector<8x1xf32>
    tpu.vector_store %arg7[%c0_10, %c0_11], %19 {strides = array<i32>} : memref<8x1xf32, #tpu.memory_space<vmem>>, vector<8x1xf32>,
    %c0_12 = arith.constant 0 : index
    %c0_13 = arith.constant 0 : index
    %21 = vector.load %arg8[%c0_12, %c0_13] : memref<8x128xf32, #tpu.memory_space<vmem>>, vector<8x128xf32>
    %22 = vector.broadcast %11 : vector<8x1xf32> to vector<8x128xf32>
    %23 = arith.mulf %22, %21 : vector<8x128xf32>
    %c0_14 = arith.constant 0 : index
    %c0_15 = arith.constant 0 : index
    %24 = vector.load %arg4[%c0_14, %c0_15] : memref<8x128xf32, #tpu.memory_space<vmem>>, vector<8x128xf32>
    %cst_16 = arith.constant dense<0.000000e+00> : vector<8x128xf32>
    %25 = tpu.matmul %14, %24, %cst_16 {dimension_numbers = #tpu.dot_dimension_numbers<[1], [0], [0], [1], [0, 0, 1, 1], [], []>} : vector<8x8xf32>, vector<8x128xf32>, vector<8x128xf32> -> vector<8x128xf32>
    %26 = arith.addf %23, %25 : vector<8x128xf32>
    %c0_17 = arith.constant 0 : index
    %c0_18 = arith.constant 0 : index
    %27 = vector.load %arg8[%c0_17, %c0_18] : memref<8x128xf32, #tpu.memory_space<vmem>>, vector<8x128xf32>
    tpu.vector_store %arg8[%c0_17, %c0_18], %26 {strides = array<i32>} : memref<8x128xf32, #tpu.memory_space<vmem>>, vector<8x128xf32>,
    %c0_19 = arith.constant 0 : index
    %c0_20 = arith.constant 0 : index
    %28 = vector.load %arg6[%c0_19, %c0_20] : memref<8x1xf32, #tpu.memory_space<vmem>>, vector<8x1xf32>
    tpu.vector_store %arg6[%c0_19, %c0_20], %9 {strides = array<i32>} : memref<8x1xf32, #tpu.memory_space<vmem>>, vector<8x1xf32>,
    %c0_i32_21 = arith.constant 0 : i32
    %29 = arith.cmpi eq, %arg1, %c0_i32_21 : i32
    %30 = arith.extui %29 : i1 to i32
    %c0_i32_22 = arith.constant 0 : i32
    %31 = arith.cmpi ne, %30, %c0_i32_22 : i32
    scf.if %31 {
      %c0_23 = arith.constant 0 : index
      %c0_24 = arith.constant 0 : index
      %32 = vector.load %arg7[%c0_23, %c0_24] : memref<8x1xf32, #tpu.memory_space<vmem>>, vector<8x1xf32>
      %33 = tpu.reciprocal %32 {approx = true} : vector<8x1xf32> -> vector<8x1xf32>
      %34 = arith.mulf %32, %33 : vector<8x1xf32>
      %cst_25 = arith.constant 2.000000e+00 : f32
      %35 = vector.broadcast %cst_25 : f32 to vector<8x1xf32>
      %36 = arith.subf %35, %34 : vector<8x1xf32>
      %37 = arith.mulf %33, %36 : vector<8x1xf32>
      %c0_26 = arith.constant 0 : index
      %c0_27 = arith.constant 0 : index
      %38 = vector.load %arg8[%c0_26, %c0_27] : memref<8x128xf32, #tpu.memory_space<vmem>>, vector<8x128xf32>
      %39 = vector.broadcast %37 : vector<8x1xf32> to vector<8x128xf32>
      %40 = arith.mulf %38, %39 : vector<8x128xf32>
      %c0_28 = arith.constant 0 : index
      %c0_29 = arith.constant 0 : index
      %41 = vector.load %arg5[%c0_28, %c0_29] : memref<8x128xf32, #tpu.memory_space<vmem>>, vector<8x128xf32>
      tpu.vector_store %arg5[%c0_28, %c0_29], %40 {strides = array<i32>} : memref<8x128xf32, #tpu.memory_space<vmem>>, vector<8x128xf32>,
    } else {
    }
    return
  }
  func.func @transform_0(%arg0: i32, %arg1: i32) -> (i32, i32) {
    %c0_i32 = arith.constant 0 : i32
    %c0_i32_0 = arith.constant 0 : i32
    return %arg0, %c0_i32 : i32, i32
  }
  func.func @transform_1(%arg0: i32, %arg1: i32) -> (i32, i32) {
    %c0_i32 = arith.constant 0 : i32
    %c0_i32_0 = arith.constant 0 : i32
    return %arg1, %c0_i32 : i32, i32
  }
  func.func @transform_2(%arg0: i32, %arg1: i32) -> (i32, i32) {
    %c0_i32 = arith.constant 0 : i32
    %c0_i32_0 = arith.constant 0 : i32
    return %arg1, %c0_i32 : i32, i32
  }
  func.func @transform_3(%arg0: i32, %arg1: i32) -> (i32, i32) {
    %c0_i32 = arith.constant 0 : i32
    %c0_i32_0 = arith.constant 0 : i32
    return %arg0, %c0_i32 : i32, i32
  }
}

module attributes {stable_mosaic.version = 11 : i64} {
  func.func @_qkv_proj_kernel(%arg0: i32, %arg1: memref<8x16xf32, #tpu.memory_space<vmem>>, %arg2: memref<16x384xf32, #tpu.memory_space<vmem>>, %arg3: memref<8x128xf32, #tpu.memory_space<vmem>>, %arg4: memref<8x128xf32, #tpu.memory_space<vmem>>, %arg5: memref<8x128xf32, #tpu.memory_space<vmem>>) attributes {dimension_semantics = [#tpu.dimension_semantics<parallel>], iteration_bounds = array<i64: 1>, scalar_prefetch = 0 : i64, scratch_operands = 0 : i64, tpu.core_type = #tpu.core_type<tc>, window_params = [{transform_indices = @transform_0, window_bounds = array<i64: 8, 16>}, {pipeline_mode = #tpu.pipeline_mode<synchronous>, transform_indices = @transform_1, window_bounds = array<i64: 16, 384>}, {transform_indices = @transform_2, window_bounds = array<i64: 8, 128>}, {transform_indices = @transform_3, window_bounds = array<i64: 8, 128>}, {transform_indices = @transform_4, window_bounds = array<i64: 8, 128>}]} {
    %c0 = arith.constant 0 : index
    %c0_0 = arith.constant 0 : index
    %0 = vector.load %arg1[%c0, %c0_0] : memref<8x16xf32, #tpu.memory_space<vmem>>, vector<8x16xf32>
    %c0_1 = arith.constant 0 : index
    %c0_2 = arith.constant 0 : index
    %1 = vector.load %arg2[%c0_1, %c0_2] : memref<16x384xf32, #tpu.memory_space<vmem>>, vector<16x384xf32>
    %cst = arith.constant dense<0.000000e+00> : vector<8x384xf32>
    %2 = tpu.matmul %0, %1, %cst {dimension_numbers = #tpu.dot_dimension_numbers<[1], [0], [0], [1], [0, 0, 1, 1], [], []>} : vector<8x16xf32>, vector<16x384xf32>, vector<8x384xf32> -> vector<8x384xf32>
    %3 = vector.extract_strided_slice %2 {offsets = [0, 0], sizes = [8, 128], strides = [1, 1]} : vector<8x384xf32> to vector<8x128xf32>
    %c0_3 = arith.constant 0 : index
    %c0_4 = arith.constant 0 : index
    %4 = vector.load %arg3[%c0_3, %c0_4] : memref<8x128xf32, #tpu.memory_space<vmem>>, vector<8x128xf32>
    tpu.vector_store %arg3[%c0_3, %c0_4], %3 {strides = array<i32>} : memref<8x128xf32, #tpu.memory_space<vmem>>, vector<8x128xf32>,
    %5 = vector.extract_strided_slice %2 {offsets = [0, 128], sizes = [8, 128], strides = [1, 1]} : vector<8x384xf32> to vector<8x128xf32>
    %c0_5 = arith.constant 0 : index
    %c0_6 = arith.constant 0 : index
    %6 = vector.load %arg4[%c0_5, %c0_6] : memref<8x128xf32, #tpu.memory_space<vmem>>, vector<8x128xf32>
    tpu.vector_store %arg4[%c0_5, %c0_6], %5 {strides = array<i32>} : memref<8x128xf32, #tpu.memory_space<vmem>>, vector<8x128xf32>,
    %7 = vector.extract_strided_slice %2 {offsets = [0, 256], sizes = [8, 128], strides = [1, 1]} : vector<8x384xf32> to vector<8x128xf32>
    %c0_7 = arith.constant 0 : index
    %c0_8 = arith.constant 0 : index
    %8 = vector.load %arg5[%c0_7, %c0_8] : memref<8x128xf32, #tpu.memory_space<vmem>>, vector<8x128xf32>
    tpu.vector_store %arg5[%c0_7, %c0_8], %7 {strides = array<i32>} : memref<8x128xf32, #tpu.memory_space<vmem>>, vector<8x128xf32>,
    return
  }
  func.func @transform_0(%arg0: i32) -> (i32, i32) {
    %c0_i32 = arith.constant 0 : i32
    %c0_i32_0 = arith.constant 0 : i32
    return %arg0, %c0_i32 : i32, i32
  }
  func.func @transform_1(%arg0: i32) -> (i32, i32) {
    %c0_i32 = arith.constant 0 : i32
    %c0_i32_0 = arith.constant 0 : i32
    %c0_i32_1 = arith.constant 0 : i32
    return %c0_i32, %c0_i32_0 : i32, i32
  }
  func.func @transform_2(%arg0: i32) -> (i32, i32) {
    %c0_i32 = arith.constant 0 : i32
    %c0_i32_0 = arith.constant 0 : i32
    return %arg0, %c0_i32 : i32, i32
  }
  func.func @transform_3(%arg0: i32) -> (i32, i32) {
    %c0_i32 = arith.constant 0 : i32
    %c0_i32_0 = arith.constant 0 : i32
    return %arg0, %c0_i32 : i32, i32
  }
  func.func @transform_4(%arg0: i32) -> (i32, i32) {
    %c0_i32 = arith.constant 0 : i32
    %c0_i32_0 = arith.constant 0 : i32
    return %arg0, %c0_i32 : i32, i32
  }
}

</mosaic_0001>

<bundles_post_ra>
// kernel: self_attention_v2.3
= control target key start
LH: loop header
LB: loop body
LE: loop exit
PB: predicated region body
PF: predicated region fallthrough
CT: control target
= control target key end

     0   :  { %8 = vsyncpa [#allocation6], 0  ;;  %s479_s0 = inlined_call_operand.hbm [shape: f32[8,128], index: 0, kind: input, shape index: {}]   ;;  %s480_s1 = inlined_call_operand.hbm [shape: f32[8,128], index: 1, kind: input, shape index: {}]   ;;  %s481_s2 = inlined_call_operand.hbm [shape: f32[8,128], index: 2, kind: input, shape index: {}]   ;;  %s482_s3 = inlined_call_operand.hbm [shape: f32[8,128], index: 3, kind: output, shape index: {}]  }
   0x1   :  { %9 = vsyncpa [#allocation9], 0 }
   0x2   :  { %10 = vsyncpa [#allocation7], 0  ;;  %s396_s12 = smov [#allocation8]   ;;  %s397_s14 = smov [#allocation5]  }
   0x3   :  { %s27_s13 = sshll.u32 %s396_s12, 4  ;;  %s17_s15 = sshll.u32 %s397_s14, 4  ;;  %s28_s13 = int_to_ptr.vmem [resolvable:$true] %s27_s13  ;;  %s18_s15 = int_to_ptr.vmem [resolvable:$true] %s17_s15 }
   0x4   :  { %s302_s18 = scalar_lea.hbm %s480_s1, 128 }
   0x5   :  { %p303_p0 = scmp.ne.s32.totalorder %s480_s1, %s302_s18  ;;  %p306_p1 = scmp.lt.u32.totalorder %s302_s18, %s480_s1 }
   0x7   :  { %p308_p2 = pnand %p306_p1, %p303_p0 }
   0x9   :  { %311 = shalt.err (!%p308_p2)
}
   0xa   :  { %s312_s23 = scalar_lea.vmem %s28_s13, 128  ;;  %p317_p4 = scmp.lt.s32.totalorder %s28_s13, %s28_s13 }
   0xb   :  { %p313_p3 = scmp.ne.s32.totalorder %s28_s13, %s312_s23  ;;  %p318_p5 = scmp.lt.s32.totalorder %s312_s23, %s312_s23 }
   0xd   :  { %p319_p6 = por %p318_p5, %p317_p4 }
   0xf   :  { %p320_p7 = pnand %p319_p6, %p313_p3 }
  0x11   :  { %323 = shalt.err (!%p320_p7)
}
  0x12   :  { %30 = dma.hbm_to_vmem [thread:$0]  %s480_s1, 128, %s28_s13, [#allocation9]  }
  0x13   :  { %s324_s28 = scalar_lea.hbm %s479_s0, 128 }
  0x14   :  { %p325_p8 = scmp.ne.s32.totalorder %s479_s0, %s324_s28  ;;  %p328_p9 = scmp.lt.u32.totalorder %s324_s28, %s479_s0 }
  0x16   :  { %p330_p10 = pnand %p328_p9, %p325_p8 }
  0x18   :  { %333 = shalt.err (!%p330_p10)
}
  0x19   :  { %s334_s6 = scalar_lea.vmem %s18_s15, 128  ;;  %p339_p12 = scmp.lt.s32.totalorder %s18_s15, %s18_s15 }
  0x1a   :  { %p335_p11 = scmp.ne.s32.totalorder %s18_s15, %s334_s6  ;;  %p340_p13 = scmp.lt.s32.totalorder %s334_s6, %s334_s6 }
  0x1c   :  { %p341_p0 = por %p340_p13, %p339_p12 }
  0x1e   :  { %p342_p1 = pnand %p341_p0, %p335_p11 }
  0x20   :  { %345 = shalt.err (!%p342_p1)
}
  0x21   :  { %20 = dma.hbm_to_vmem [thread:$0]  %s479_s0, 128, %s18_s15, [#allocation6]  }
  0x22   :  { %s398_s8 = smov [#allocation10]   ;;  %s346_s12 = scalar_lea.hbm %s481_s2, 128 }
  0x23   :  { %s37_s9 = sshll.u32 %s398_s8, 4  ;;  %p347_p2 = scmp.ne.s32.totalorder %s481_s2, %s346_s12  ;;  %s38_s9 = int_to_ptr.vmem [resolvable:$true] %s37_s9 }
  0x24   :  { %p350_p3 = scmp.lt.u32.totalorder %s346_s12, %s481_s2 }
  0x26   :  { %p352_p4 = pnand %p350_p3, %p347_p2 }
  0x28   :  { %355 = shalt.err (!%p352_p4)
}
  0x29   :  { %s356_s18 = scalar_lea.vmem %s38_s9, 128  ;;  %p361_p6 = scmp.lt.s32.totalorder %s38_s9, %s38_s9 }
  0x2a   :  { %p357_p5 = scmp.ne.s32.totalorder %s38_s9, %s356_s18  ;;  %p362_p7 = scmp.lt.s32.totalorder %s356_s18, %s356_s18 }
  0x2c   :  { %p363_p8 = por %p362_p7, %p361_p6 }
  0x2e   :  { %p364_p9 = pnand %p363_p8, %p357_p5 }
  0x30   :  { %367 = shalt.err (!%p364_p9)
}
  0x31   :  { %40 = dma.hbm_to_vmem [thread:$0]  %s481_s2, 128, %s38_s9, [#allocation9]  }
  0x32   :  { %390 = dma.done.wait [#allocation6], 128  }
  0x33   :  { %391 = vsyncadd [#allocation6], 4294967168 }
  0x34   :  { %392 = dma.done.wait [#allocation9], 256  }
  0x35   :  { %393 = vsyncadd [#allocation9], 4294967040  ;;  %vm54_vm0 = vcmask 7168   ;;  %v399_v0 = vmov 0.0   ;;  %vm400_vm1 = vmmov 0   ;;  %v59_v1 = vld [vmem:[#allocation8] sm:$0xff] }
  0x36   :  { %56 = vst.msk [vmem:[#allocation3] sm:$0xff] %vm54_vm0, %v399_v0  ;;  %276 = vmatprep.subr.mxu0 %v399_v0  ;;  %278 = vmatprep.mubr.msk.f32.mxu0 %vm400_vm1, %v399_v0  ;;  %v58_v2 = vld [vmem:[#allocation5] sm:$0xff]  ;;  %v401_v3 = vmov -inf   ;;  %vm131_vm2 = vcmask 64512   ;;  %v402_v7 = vmov 0   ;;  %v162_v12 = vld [vmem:[#allocation10] sm:$0xff] }
  0x37   :  { %281 = vmatprep.subr.mxu1 %v399_v0  ;;  %283 = vmatprep.mubr.msk.f32.mxu1 %vm400_vm1, %v399_v0  ;;  %55 = vst.msk [vmem:[#allocation2] sm:$0xff] %vm54_vm0, %v401_v3  ;;  %s403_s2 = smov [#allocation11]  }
  0x38   :  { %277 = vmatpush3.xpose.msra.mxu0 %v59_v1  ;;  %294 = vset.pattern.permute.xlu0 %v402_v7  ;;  %s261_s19 = sshll.u32 %s403_s2, 4  ;;  %s262_s19 = int_to_ptr.vmem [resolvable:$true] %s261_s19 }
  0x39   :  { %295 = vset.pattern.permute.xlu1 %v402_v7  ;;  %282 = vmatpush3.msra.mxu1 %v162_v12  ;;  %s368_s20 = scalar_lea.vmem %s262_s19, 128  ;;  %p373_p11 = scmp.lt.s32.totalorder %s262_s19, %s262_s19 }
  0x3a   :  { %p369_p10 = scmp.ne.s32.totalorder %s262_s19, %s368_s20  ;;  %p374_p12 = scmp.lt.s32.totalorder %s368_s20, %s368_s20 }
  0x3b   :  { %279 = vmatmul.mubr.f32.vlgmr.msra.gmra.mrb[0].mxu0 %v58_v2 }
  0x3c   :  { %p375_p13 = por %p374_p12, %p373_p11 }
  0x3d   :  { %v147_v20 = vld [vmem:[#allocation3] sm:$0xff] }
  0x3e   :  { %v130_v8 = vld [vmem:[#allocation2] sm:$0xff]  ;;  %p376_p0 = pnand %p375_p13, %p369_p10 }
 0x10e   :  { %v126_v4 = vpop.f32.mrb[0].mxu0 }
 0x10f   :  { %v280_v5 = vpop.f32.mrb[1].mxu0  ;;  %v132_v6 = vsel %vm131_vm2, %v126_v4, -inf }
 0x110   :  { %133 = vmax.xlane.f32.xlu0 %v132_v6 }
 0x19d   :  { %v134_v9 = vpop.xlane.xlu0 %133 }
 0x19e   :  { %v135_v10 = vmax.f32 %v130_v8, %v134_v9 }
 0x1a0   :  { %v136_v11 = vsub.f32 %v130_v8, %v135_v10  ;;  %238 = vst.msk [vmem:[#allocation2] sm:$0xff] %vm54_vm0, %v135_v10  ;;  %141 = vperm.xlu0 %294, %v135_v10  }
 0x1a2   :  { %v137_v18 = vmul.f32 1.442695, %v136_v11 }
 0x21f   :  { %v142_v13 = vpop.permute.xlu0 %141 }
 0x220   :  { %v144_v14 = vsub.f32 %v126_v4, %v142_v13 }
 0x222   :  { %v145_v15 = vmul.f32 1.442695, %v144_v14 }
 0x224   :  { %296 = vpow2.f32 %v145_v15 }
 0x225   :  { %298 = vpow2.f32 %v137_v18 }
 0x22e   :  { %v297_v16 = vpop.eup %296 }
 0x22f   :  { %284 = vmatmul.mubr.msk.f32.vlgmr.msra.gmra.mrb[0].mxu1 %vm131_vm2, %v297_v16  ;;  %v149_v17 = vsel %vm131_vm2, %v297_v16, 0.0  ;;  %v299_v19 = vpop.eup %298 }
 0x230   :  { %150 = vadd.xlane.f32.xlu1 %v149_v17  ;;  %v148_v21 = vmul.f32 %v299_v19, %v147_v20 }
 0x241   :  { %158 = vperm.xlu1 %295, %v299_v19  }
 0x2bd   :  { %v151_v22 = vpop.xlane.xlu1 %150 }
 0x2be   :  { %v152_v23 = vadd.f32 %v151_v22, %v148_v21 }
 0x2c0   :  { %154 = vst.msk [vmem:[#allocation3] sm:$0xff] %vm54_vm0, %v152_v23 }
 0x2c1   :  { %v159_v31 = vpop.permute.xlu1 %158 }
 0x2c2   :  { %v161_v32 = vmul.f32 0.0, %v159_v31 }
 0x2c7   :  { %v242_v24 = vld [vmem:[#allocation3] sm:$0xff] }
 0x2c8   :  { %300 = vrcp.f32 %v242_v24 }
 0x2d2   :  { %v301_v25 = vpop.eup %300 }
 0x2d3   :  { %v244_v26 = vmul.f32 %v301_v25, %v242_v24 }
 0x2d5   :  { %v245_v27 = vsub.f32 2.0, %v244_v26 }
 0x2d7   :  { %v246_v28 = vmul.f32 %v301_v25, %v245_v27 }
 0x2d9   :  { %250 = vperm.xlu1 %295, %v246_v28  }
 0x302   :  { %v232_v29 = vpop.f32.mrb[0].mxu1 }
 0x303   :  { %v285_v30 = vpop.f32.mrb[1].mxu1  ;;  %v236_v33 = vadd.f32 %v232_v29, %v161_v32 }
 0x358   :  { %v251_v34 = vpop.permute.xlu1 %250 }
 0x359   :  { %v253_v35 = vmul.f32 %v251_v34, %v236_v33 }
 0x35b   :  { %254 = vst [vmem:[#allocation11] sm:$0xff] %v253_v35 }
 0x35c   :  { %379 = shalt.err (!%p376_p0)
}
 0x35d   :  { %s380_s23 = scalar_lea.hbm %s482_s3, 128 }
 0x35e   :  { %p381_p1 = scmp.ne.s32.totalorder %s482_s3, %s380_s23  ;;  %p384_p2 = scmp.lt.u32.totalorder %s380_s23, %s482_s3 }
 0x360   :  { %p386_p3 = pnand %p384_p2, %p381_p1 }
 0x362   :  { %389 = shalt.err (!%p386_p3)
}
 0x363   :  { %264 = dma.vmem_to_hbm [thread:$0]  %s262_s19, 128, %s482_s3, [#allocation7]  }
 0x364   :  { %394 = dma.done.wait [#allocation7], 128  }
 0x365   :  { %395 = vsyncadd [#allocation7], 4294967168 }
 0x366   :  { %268 = vsyncpa [#allocation6], 1 }
 0x367   :  { %269 = vsyncpa [#allocation9], 1 }
 0x368   :  { %270 = vsyncpa [#allocation7], 1 }

// kernel: self_attention_v2.2
= control target key start
LH: loop header
LB: loop body
LE: loop exit
PB: predicated region body
PF: predicated region fallthrough
CT: control target
= control target key end

     0   :  { %10 = vsyncpa [#allocation3], 0  ;;  %s503_s0 = inlined_call_operand.hbm [shape: f32[8,16], index: 0, kind: input, shape index: {}]   ;;  %s504_s1 = inlined_call_operand.hbm [shape: f32[16,384], index: 1, kind: input, shape index: {}]   ;;  %s505_s2 = inlined_call_operand.hbm [shape: f32[8,128], index: 2, kind: output, shape index: {0}]   ;;  %s506_s3 = inlined_call_operand.hbm [shape: f32[8,128], index: 3, kind: output, shape index: {1}]   ;;  %s507_s4 = inlined_call_operand.hbm [shape: f32[8,128], index: 4, kind: output, shape index: {2}]  }
   0x1   :  { %11 = vsyncpa [#allocation6], 0 }
   0x2   :  { %12 = vsyncpa [#allocation4], 0 }
   0x3   :  { %13 = vsyncpa [#allocation9], 0  ;;  %s387_s15 = smov [#allocation2]   ;;  %s388_s17 = smov [#allocation5]  }
   0x4   :  { %s20_s16 = sshll.u32 %s387_s15, 4  ;;  %s29_s18 = sshll.u32 %s388_s17, 4  ;;  %s21_s16 = int_to_ptr.vmem [resolvable:$true] %s20_s16  ;;  %s422_s18 = int_to_ptr.vmem [resolvable:$true] %s29_s18 }
   0x5   :  { %s269_s21 = scalar_lea.hbm %s503_s0, 128 }
   0x6   :  { %p270_p0 = scmp.ne.s32.totalorder %s503_s0, %s269_s21  ;;  %p273_p1 = scmp.lt.u32.totalorder %s269_s21, %s503_s0 }
   0x8   :  { %p275_p2 = pnand %p273_p1, %p270_p0 }
   0xa   :  { %278 = shalt.err (!%p275_p2)
}
   0xb   :  { %s279_s26 = scalar_lea.vmem %s21_s16, 128  ;;  %p284_p4 = scmp.lt.s32.totalorder %s21_s16, %s21_s16 }
   0xc   :  { %p280_p3 = scmp.ne.s32.totalorder %s21_s16, %s279_s26  ;;  %p285_p5 = scmp.lt.s32.totalorder %s279_s26, %s279_s26 }
   0xe   :  { %p286_p6 = por %p285_p5, %p284_p4 }
  0x10   :  { %p287_p7 = pnand %p286_p6, %p280_p3 }
  0x12   :  { %290 = shalt.err (!%p287_p7)
}
  0x13   :  { %23 = dma.hbm_to_vmem [thread:$0]  %s503_s0, 128, %s21_s16, [#allocation3]  }
  0x14   :  { %s291_s5 = scalar_lea.hbm %s504_s1, 768 }
  0x15   :  { %p292_p8 = scmp.ne.s32.totalorder %s504_s1, %s291_s5  ;;  %p295_p9 = scmp.lt.u32.totalorder %s291_s5, %s504_s1 }
  0x17   :  { %p297_p10 = pnand %p295_p9, %p292_p8 }
  0x19   :  { %300 = shalt.err (!%p297_p10)
}
  0x1a   :  { %s301_s10 = scalar_lea.vmem %s422_s18, 768  ;;  %p306_p12 = scmp.lt.s32.totalorder %s422_s18, %s422_s18 }
  0x1b   :  { %p302_p11 = scmp.ne.s32.totalorder %s422_s18, %s301_s10  ;;  %p307_p13 = scmp.lt.s32.totalorder %s301_s10, %s301_s10 }
  0x1d   :  { %p308_p0 = por %p307_p13, %p306_p12 }
  0x1f   :  { %p309_p1 = pnand %p308_p0, %p302_p11 }
  0x21   :  { %312 = shalt.err (!%p309_p1)
}
  0x22   :  { %s389_s0 = smov 384   ;;  %s390_s11 = smov 24  }
  0x23   :  { %35 = dma.hbm_to_vmem [thread:$0]  %s504_s1, 768, %s422_s18, [#allocation6], %s389_s0, %s389_s0, %s390_s11  }
  0x24   :  { %379 = dma.done.wait [#allocation3], 128  }
  0x25   :  { %380 = vsyncadd [#allocation3], 4294967168 }
  0x26   :  { %381 = dma.done.wait [#allocation6], 768  }
  0x27   :  { %382 = vsyncadd [#allocation6], 4294966528  ;;  %v391_v0 = vmov 0.0|0.0   ;;  %v392_v1 = vmov 0.0   ;;  %vm393_vm0 = vmmov 0   ;;  %v44_v2 = vld [vmem:[#allocation5 + $0x8] sm:$0xff] }
  0x28   :  { %256 = vmatprep.subr.bf16.mxu1 %v391_v0  ;;  %117 = vmatprep.mubr.f32.mxu0 %v392_v1  ;;  %v47_v3 = vld [vmem:[#allocation5 + $0x20] sm:$0xff]  ;;  %v46_v6 = vld [vmem:[#allocation5 + $0x18] sm:$0xff]  ;;  %v45_v7 = vld [vmem:[#allocation5 + $0x10] sm:$0xff]  ;;  %vm49_vm1 = vcmask 130048   ;;  %s394_s1 = smov [#allocation7]   ;;  %s395_s15 = smov [#allocation8]  }
  0x29   :  { %249 = vmatprep.mubr.msk.f32.mxu1 %vm393_vm0, %v392_v1  ;;  %v43_v4 = vld [vmem:[#allocation5] sm:$0xff]  ;;  %v252_v5 = vpack.c.bf16 %v47_v3, %v44_v2  ;;  %v48_v8 = vld [vmem:[#allocation5 + $0x28] sm:$0xff]  ;;  %v42_v11 = vld [vmem:[#allocation2] sm:$0xff]  ;;  %s203_s14 = sshll.u32 %s394_s1, 4  ;;  %s213_s16 = sshll.u32 %s395_s15, 4  ;;  %s204_s14 = int_to_ptr.vmem [resolvable:$true] %s203_s14  ;;  %s453_s16 = int_to_ptr.vmem [resolvable:$true] %s213_s16 }
  0x2a   :  { %v254_v9 = vpack.c.bf16 %v46_v6, %v43_v4  ;;  %v257_v10 = vpack.c.bf16 %v48_v8, %v45_v7  ;;  %s396_s17 = smov [#allocation10]   ;;  %s313_s19 = scalar_lea.vmem %s204_s14, 128 }
  0x2b   :  { %253 = vmatprep.subr.bf16.mxu0 %v252_v5  ;;  %s223_s18 = sshll.u32 %s396_s17, 4  ;;  %p314_p2 = scmp.ne.s32.totalorder %s204_s14, %s313_s19  ;;  %s455_s18 = int_to_ptr.vmem [resolvable:$true] %s223_s18 }
  0x2c   :  { %255 = vmatpush1.bf16.msra.mxu0 %v254_v9  ;;  %258 = vmatpush3.bf16.msra.mxu1 %v257_v10  ;;  %p318_p3 = scmp.lt.s32.totalorder %s204_s14, %s204_s14  ;;  %p319_p4 = scmp.lt.s32.totalorder %s313_s19, %s313_s19 }
  0x2e   :  { %p320_p5 = por %p319_p4, %p318_p3 }
  0x2f   :  { %240 = vmatmul.mubr.msk.f32.vlgmr.msra.gmra.mrb[0].mxu0 %vm49_vm1, %v42_v11  ;;  %250 = vmatmul.mubr.msk.f32.vlgmr.msra.gmra.mrb[0].mxu1 %vm49_vm1, %v42_v11 }
  0x30   :  { %p321_p6 = pnand %p320_p5, %p314_p2 }
 0x102   :  { %v119_v12 = vpop.f32.mrb[0].mxu0  ;;  %v190_v13 = vpop.f32.mrb[0].mxu1 }
 0x103   :  { %194 = vst [vmem:[#allocation7] sm:$0xff] %v119_v12  ;;  %v121_v14 = vpop.f32.mrb[1].mxu0  ;;  %196 = vst [vmem:[#allocation10] sm:$0xff] %v190_v13  ;;  %v251_v15 = vpop.f32.mrb[1].mxu1 }
 0x104   :  { %195 = vst [vmem:[#allocation8] sm:$0xff] %v121_v14 }
 0x105   :  { %324 = shalt.err (!%p321_p6)
}
 0x106   :  { %s325_s22 = scalar_lea.hbm %s505_s2, 128 }
 0x107   :  { %p326_p7 = scmp.ne.s32.totalorder %s505_s2, %s325_s22  ;;  %p329_p8 = scmp.lt.u32.totalorder %s325_s22, %s505_s2 }
 0x109   :  { %p331_p9 = pnand %p329_p8, %p326_p7 }
 0x10b   :  { %334 = shalt.err (!%p331_p9)
}
 0x10c   :  { %206 = dma.vmem_to_hbm [thread:$0]  %s204_s14, 128, %s505_s2, [#allocation4]  }
 0x10d   :  { %s335_s29 = scalar_lea.vmem %s453_s16, 128  ;;  %p340_p11 = scmp.lt.s32.totalorder %s453_s16, %s453_s16 }
 0x10e   :  { %p336_p10 = scmp.ne.s32.totalorder %s453_s16, %s335_s29  ;;  %p341_p12 = scmp.lt.s32.totalorder %s335_s29, %s335_s29 }
 0x110   :  { %p342_p13 = por %p341_p12, %p340_p11 }
 0x112   :  { %p343_p0 = pnand %p342_p13, %p336_p10 }
 0x114   :  { %346 = shalt.err (!%p343_p0)
}
 0x115   :  { %s347_s6 = scalar_lea.hbm %s506_s3, 128 }
 0x116   :  { %p348_p1 = scmp.ne.s32.totalorder %s506_s3, %s347_s6  ;;  %p351_p2 = scmp.lt.u32.totalorder %s347_s6, %s506_s3 }
 0x118   :  { %p353_p3 = pnand %p351_p2, %p348_p1 }
 0x11a   :  { %356 = shalt.err (!%p353_p3)
}
 0x11b   :  { %216 = dma.vmem_to_hbm [thread:$0]  %s453_s16, 128, %s506_s3, [#allocation9]  }
 0x11c   :  { %s357_s11 = scalar_lea.vmem %s455_s18, 128  ;;  %p362_p5 = scmp.lt.s32.totalorder %s455_s18, %s455_s18 }
 0x11d   :  { %p358_p4 = scmp.ne.s32.totalorder %s455_s18, %s357_s11  ;;  %p363_p6 = scmp.lt.s32.totalorder %s357_s11, %s357_s11 }
 0x11f   :  { %p364_p7 = por %p363_p6, %p362_p5 }
 0x121   :  { %p365_p8 = pnand %p364_p7, %p358_p4 }
 0x123   :  { %368 = shalt.err (!%p365_p8)
}
 0x124   :  { %s369_s1 = scalar_lea.hbm %s507_s4, 128 }
 0x125   :  { %p370_p9 = scmp.ne.s32.totalorder %s507_s4, %s369_s1  ;;  %p373_p10 = scmp.lt.u32.totalorder %s369_s1, %s507_s4 }
 0x127   :  { %p375_p11 = pnand %p373_p10, %p370_p9 }
 0x129   :  { %378 = shalt.err (!%p375_p11)
}
 0x12a   :  { %226 = dma.vmem_to_hbm [thread:$0]  %s455_s18, 128, %s507_s4, [#allocation9]  }
 0x12b   :  { %383 = dma.done.wait [#allocation4], 128  }
 0x12c   :  { %384 = vsyncadd [#allocation4], 4294967168 }
 0x12d   :  { %385 = dma.done.wait [#allocation9], 256  }
 0x12e   :  { %386 = vsyncadd [#allocation9], 4294967040 }
 0x12f   :  { %236 = vsyncpa [#allocation3], 1 }
 0x130   :  { %237 = vsyncpa [#allocation6], 1 }
 0x131   :  { %238 = vsyncpa [#allocation4], 1 }
 0x132   :  { %239 = vsyncpa [#allocation9], 1 }

</bundles_post_ra>
